<compile_context>
chip_gen: v5e
topology: v5e:2x2
jax: 0.10.0
libtpu: 0.0.40
codegen_flags: <defaults>
</compile_context>

<pallas_src>
import functools

import jax
import jax.numpy as jnp
from jax.experimental import pallas as pl
from jax.experimental.pallas import tpu as pltpu

LANE = 128          # native lane width: padded hidden / action feature size
NEG_INF = -1e30     # "minus infinity" bias for padded action logits
W_DTYPE = jnp.bfloat16   # MXU operand dtype (weights + activations into the dots)
OUT_DTYPE = jnp.bfloat16  # HBM writeback dtype for the prob tiles


def _round_up(n, m):
    return ((n + m - 1) // m) * m


def policy_kernel(x_ref, w_ref, b_ref, out_ref, *, s_pad):
    """Fused 3-layer MLP + softmax for one batch tile.

    x_ref  : (TB, s_pad)   bf16 activations for this batch tile
    w_ref  : (s_pad + 2*LANE, LANE) bf16  [w1; w2; w3] row-concatenated, zero padded
    b_ref  : (8, LANE)     f32  rows 0..2 = b1, b2, b3 (b3 padded cols = -1e30)
    out_ref: (TB, LANE)    bf16 softmax probs; padded action cols come out 0
    """
    x = x_ref[...]
    w1 = w_ref[0:s_pad, :]
    w2 = w_ref[s_pad:s_pad + LANE, :]
    w3 = w_ref[s_pad + LANE:s_pad + 2 * LANE, :]

    # fc1 + ReLU (bf16 MXU operands, f32 accumulate + f32 epilogue)
    h1 = jnp.dot(x, w1, preferred_element_type=jnp.float32) + b_ref[0:1, :]
    h1 = jnp.maximum(h1, 0.0).astype(w_ref.dtype)

    # fc2 + ReLU
    h2 = jnp.dot(h1, w2, preferred_element_type=jnp.float32) + b_ref[1:2, :]
    h2 = jnp.maximum(h2, 0.0).astype(w_ref.dtype)

    # fc3 logits (f32).  Padded action columns of w3 are all-zero and their
    # bias is -1e30, so those logits underflow to zero probability.
    logits = jnp.dot(h2, w3, preferred_element_type=jnp.float32) + b_ref[2:3, :]

    # numerically-stable softmax over the action (last) axis == torch softmax(dim=1)
    m = jnp.max(logits, axis=-1, keepdims=True)
    e = jnp.exp(logits - m)
    denom = jnp.sum(e, axis=-1, keepdims=True)
    # EUP approximate reciprocal + one Newton refinement -> near-exact 1/denom
    r = pl.reciprocal(denom, approx=True)
    r = r * (2.0 - denom * r)
    out_ref[...] = (e * r).astype(out_ref.dtype)


def pack_params(params, state_size, action_size):
    """Pad raw params to lane-native widths and pack into two buffers.

    Weights -> one bf16 row-concatenated buffer (MXU operands).
    Biases  -> one f32 (8, LANE) buffer (epilogue stays f32 on all chip gens).
    """
    w1, b1, w2, b2, w3, b3 = params
    h1_units = w1.shape[1]
    h2_units = w2.shape[1]
    assert h1_units <= LANE and h2_units <= LANE and action_size <= LANE

    # 16-row alignment keeps bf16 sublane packs aligned for the static row
    # slices inside the kernel.  Do NOT pad this up to 128 (16x wasted fc1 work).
    s_pad = _round_up(state_size, 16)

    w1p = jnp.zeros((s_pad, LANE), W_DTYPE).at[:state_size, :h1_units].set(
        w1.astype(W_DTYPE))
    w2p = jnp.zeros((LANE, LANE), W_DTYPE).at[:h1_units, :h2_units].set(
        w2.astype(W_DTYPE))
    w3p = jnp.zeros((LANE, LANE), W_DTYPE).at[:h2_units, :action_size].set(
        w3.astype(W_DTYPE))
    w_cat = jnp.concatenate([w1p, w2p, w3p], axis=0)   # (s_pad + 2*LANE, LANE)

    b_cat = jnp.zeros((8, LANE), jnp.float32)
    b_cat = b_cat.at[0, :h1_units].set(b1.reshape(-1).astype(jnp.float32))
    b_cat = b_cat.at[1, :h2_units].set(b2.reshape(-1).astype(jnp.float32))
    b3_row = jnp.full((LANE,), NEG_INF, jnp.float32).at[:action_size].set(
        b3.reshape(-1).astype(jnp.float32))
    b_cat = b_cat.at[2, :].set(b3_row)                  # (8, LANE)

    return w_cat, b_cat


def _pick_block_b(B):
    """Batch tile: large, 256-aligned, >=2 grid steps, bounded padding waste."""
    if B < 512:
        # Single small tile for act()/tiny rollout batches: minimal padding
        # and writeback beats MXU-M fill at these sizes.
        return _round_up(max(B, 1), 8)
    # Largest MXU-M-aligned tile (multiple of 256, <= 1024) that still gives
    # >= 2 grid steps (so both v7x TensorCores get work) and keeps dead-row
    # padding <= ~25% of B.
    for cand in (1024, 768, 512):
        b_pad = _round_up(B, cand)
        if 2 * cand <= b_pad and (b_pad - B) * 4 <= B:
            return cand
    return 256


def policy_forward(x, packed, *, action_size, block_b=None):
    """x: [B, state_size] f32 -> action probabilities [B, action_size] f32."""
    w_cat, b_cat = packed
    B, S = x.shape
    s_pad = w_cat.shape[0] - 2 * LANE
    assert S <= s_pad

    if block_b is None:
        block_b = _pick_block_b(B)
    b_pad = _round_up(B, block_b)

    # Zero-pad activations to the packed state width / whole batch tiles and
    # cast to the bf16 MXU operand dtype (skip the copy when no padding needed).
    if (b_pad, s_pad) == (B, S):
        x_p = x.astype(W_DTYPE)
    else:
        x_p = jnp.zeros((b_pad, s_pad), W_DTYPE).at[:B, :S].set(x.astype(W_DTYPE))

    grid = (b_pad // block_b,)
    flops = 2 * b_pad * (s_pad * LANE + 2 * LANE * LANE)
    bytes_accessed = (
        b_pad * s_pad * 2                       # x (bf16)
        + w_cat.size * 2                        # packed weights (bf16, resident)
        + b_cat.size * 4                        # packed biases (f32)
        + b_pad * LANE * jnp.dtype(OUT_DTYPE).itemsize  # prob writeback (bf16)
    )

    probs_padded = pl.pallas_call(
        functools.partial(policy_kernel, s_pad=s_pad),
        out_shape=jax.ShapeDtypeStruct((b_pad, LANE), OUT_DTYPE),
        grid=grid,
        in_specs=[
            pl.BlockSpec((block_b, s_pad), lambda i: (i, 0)),          # x tile
            pl.BlockSpec((s_pad + 2 * LANE, LANE), lambda i: (0, 0)),  # packed weights
            pl.BlockSpec((8, LANE), lambda i: (0, 0)),                 # packed biases
        ],
        out_specs=pl.BlockSpec((block_b, LANE), lambda i: (i, 0)),
        compiler_params=pltpu.CompilerParams(
            dimension_semantics=("parallel",)),
        cost_estimate=pl.CostEstimate(
            flops=flops,
            transcendentals=b_pad * LANE,
            bytes_accessed=bytes_accessed),
    )(x_p, w_cat, b_cat)

    return probs_padded[:B, :action_size].astype(jnp.float32)


def init_params(key, state_size, action_size, fc1_units=16, fc2_units=64):
    """Deterministic init mimicking nn.Linear's U(-1/sqrt(fan_in), 1/sqrt(fan_in)).

    Weights are stored as [in_features, out_features] (transpose of PyTorch's
    nn.Linear layout) so the kernel does plain row-major matmuls.
    """
    def linear(k, fan_in, fan_out):
        kw, kb = jax.random.split(k)
        bound = 1.0 / jnp.sqrt(jnp.float32(fan_in))
        w = jax.random.uniform(kw, (fan_in, fan_out), jnp.float32, -bound, bound)
        b = jax.random.uniform(kb, (1, fan_out), jnp.float32, -bound, bound)
        return w, b

    k1, k2, k3 = jax.random.split(key, 3)
    w1, b1 = linear(k1, state_size, fc1_units)
    w2, b2 = linear(k2, fc1_units, fc2_units)
    w3, b3 = linear(k3, fc2_units, action_size)
    return (w1, b1, w2, b2, w3, b3)


if __name__ == "__main__":
    key = jax.random.PRNGKey(0)
    k_params, k_x, k_x2 = jax.random.split(key, 3)

    state_size = 8       # e.g. LunarLander-style small state
    action_size = 4

    params = init_params(k_params, state_size, action_size, fc1_units=16, fc2_units=64)
    packed = pack_params(params, state_size, action_size)

    def ref_forward(xx):
        w1, b1, w2, b2, w3, b3 = params
        h = jnp.maximum(xx @ w1 + b1, 0.0)
        h = jnp.maximum(h @ w2 + b2, 0.0)
        return jax.nn.softmax(h @ w3 + b3, axis=-1)

    # Small act()-style batch -> single 8-aligned tile.
    x_small = jax.random.normal(k_x, (8, state_size), jnp.float32)
    p_small = jax.block_until_ready(
        policy_forward(x_small, packed, action_size=action_size))
    assert p_small.shape == (8, action_size)
    assert jnp.allclose(jnp.sum(p_small, axis=-1), 1.0, atol=2e-2)
    assert jnp.allclose(p_small, ref_forward(x_small), atol=3e-2)

    # Rollout-style batch -> multi-step, MXU-M-aligned tile path (grid > 1).
    x_big = jax.random.normal(k_x2, (600, state_size), jnp.float32)
    p_big = jax.block_until_ready(
        policy_forward(x_big, packed, action_size=action_size))
    assert p_big.shape == (600, action_size)
    assert jnp.allclose(jnp.sum(p_big, axis=-1), 1.0, atol=2e-2)
    assert jnp.allclose(p_big, ref_forward(x_big), atol=3e-2)

    print("KERNEL_OK")
</pallas_src>

<mosaic_0001>
module attributes {stable_mosaic.version = 11 : i64} {
  func.func @policy_kernel(%arg0: i32, %arg1: memref<8x16xbf16, #tpu.memory_space<vmem>>, %arg2: memref<272x128xbf16, #tpu.memory_space<vmem>>, %arg3: memref<8x128xf32, #tpu.memory_space<vmem>>, %arg4: memref<8x128xbf16, #tpu.memory_space<vmem>>) attributes {dimension_semantics = [#tpu.dimension_semantics<parallel>], iteration_bounds = array<i64: 1>, scalar_prefetch = 0 : i64, scratch_operands = 0 : i64, tpu.core_type = #tpu.core_type<tc>, window_params = [{transform_indices = @transform_0, window_bounds = array<i64: 8, 16>}, {pipeline_mode = #tpu.pipeline_mode<synchronous>, transform_indices = @transform_1, window_bounds = array<i64: 272, 128>}, {pipeline_mode = #tpu.pipeline_mode<synchronous>, transform_indices = @transform_2, window_bounds = array<i64: 8, 128>}, {transform_indices = @transform_3, window_bounds = array<i64: 8, 128>}]} {
    %c0 = arith.constant 0 : index
    %c0_0 = arith.constant 0 : index
    %0 = vector.load %arg1[%c0, %c0_0] : memref<8x16xbf16, #tpu.memory_space<vmem>>, vector<8x16xbf16>
    %c0_1 = arith.constant 0 : index
    %c0_2 = arith.constant 0 : index
    %1 = vector.load %arg2[%c0_1, %c0_2] : memref<272x128xbf16, #tpu.memory_space<vmem>>, vector<16x128xbf16>
    %c16 = arith.constant 16 : index
    %c0_3 = arith.constant 0 : index
    %2 = vector.load %arg2[%c16, %c0_3] : memref<272x128xbf16, #tpu.memory_space<vmem>>, vector<128x128xbf16>
    %c144 = arith.constant 144 : index
    %c0_4 = arith.constant 0 : index
    %3 = vector.load %arg2[%c144, %c0_4] : memref<272x128xbf16, #tpu.memory_space<vmem>>, vector<128x128xbf16>
    %cst = arith.constant dense<0.000000e+00> : vector<8x128xf32>
    %4 = tpu.matmul %0, %1, %cst {dimension_numbers = #tpu.dot_dimension_numbers<[1], [0], [0], [1], [0, 0, 1, 1], [], []>} : vector<8x16xbf16>, vector<16x128xbf16>, vector<8x128xf32> -> vector<8x128xf32>
    %c0_5 = arith.constant 0 : index
    %c0_6 = arith.constant 0 : index
    %5 = vector.load %arg3[%c0_5, %c0_6] : memref<8x128xf32, #tpu.memory_space<vmem>>, vector<1x128xf32>
    %6 = vector.broadcast %5 : vector<1x128xf32> to vector<8x128xf32>
    %7 = arith.addf %4, %6 : vector<8x128xf32>
    %cst_7 = arith.constant 0.000000e+00 : f32
    %8 = vector.broadcast %cst_7 : f32 to vector<8x128xf32>
    %9 = arith.maximumf %7, %8 : vector<8x128xf32>
    %10 = arith.truncf %9 : vector<8x128xf32> to vector<8x128xbf16>
    %cst_8 = arith.constant dense<0.000000e+00> : vector<8x128xf32>
    %11 = tpu.matmul %10, %2, %cst_8 {dimension_numbers = #tpu.dot_dimension_numbers<[1], [0], [0], [1], [0, 0, 1, 1], [], []>} : vector<8x128xbf16>, vector<128x128xbf16>, vector<8x128xf32> -> vector<8x128xf32>
    %c1 = arith.constant 1 : index
    %c0_9 = arith.constant 0 : index
    %12 = vector.load %arg3[%c1, %c0_9] : memref<8x128xf32, #tpu.memory_space<vmem>>, vector<1x128xf32>
    %13 = vector.broadcast %12 : vector<1x128xf32> to vector<8x128xf32>
    %14 = arith.addf %11, %13 : vector<8x128xf32>
    %cst_10 = arith.constant 0.000000e+00 : f32
    %15 = vector.broadcast %cst_10 : f32 to vector<8x128xf32>
    %16 = arith.maximumf %14, %15 : vector<8x128xf32>
    %17 = arith.truncf %16 : vector<8x128xf32> to vector<8x128xbf16>
    %cst_11 = arith.constant dense<0.000000e+00> : vector<8x128xf32>
    %18 = tpu.matmul %17, %3, %cst_11 {dimension_numbers = #tpu.dot_dimension_numbers<[1], [0], [0], [1], [0, 0, 1, 1], [], []>} : vector<8x128xbf16>, vector<128x128xbf16>, vector<8x128xf32> -> vector<8x128xf32>
    %c2 = arith.constant 2 : index
    %c0_12 = arith.constant 0 : index
    %19 = vector.load %arg3[%c2, %c0_12] : memref<8x128xf32, #tpu.memory_space<vmem>>, vector<1x128xf32>
    %20 = vector.broadcast %19 : vector<1x128xf32> to vector<8x128xf32>
    %21 = arith.addf %18, %20 : vector<8x128xf32>
    %cst_13 = arith.constant dense<0xFF800000> : vector<8xf32>
    %22 = vector.multi_reduction <maximumf>, %21, %cst_13 [1] : vector<8x128xf32> to vector<8xf32>
    %23 = vector.shape_cast %22 : vector<8xf32> to vector<8x1xf32>
    %24 = vector.broadcast %23 : vector<8x1xf32> to vector<8x128xf32>
    %25 = arith.subf %21, %24 : vector<8x128xf32>
    %26 = math.exp %25 : vector<8x128xf32>
    %cst_14 = arith.constant dense<0.000000e+00> : vector<8xf32>
    %27 = vector.multi_reduction <add>, %26, %cst_14 [1] : vector<8x128xf32> to vector<8xf32>
    %28 = vector.shape_cast %27 : vector<8xf32> to vector<8x1xf32>
    %29 = tpu.reciprocal %28 {approx = true} : vector<8x1xf32> -> vector<8x1xf32>
    %30 = arith.mulf %28, %29 : vector<8x1xf32>
    %cst_15 = arith.constant 2.000000e+00 : f32
    %31 = vector.broadcast %cst_15 : f32 to vector<8x1xf32>
    %32 = arith.subf %31, %30 : vector<8x1xf32>
    %33 = arith.mulf %29, %32 : vector<8x1xf32>
    %34 = vector.broadcast %33 : vector<8x1xf32> to vector<8x128xf32>
    %35 = arith.mulf %26, %34 : vector<8x128xf32>
    %36 = arith.truncf %35 : vector<8x128xf32> to vector<8x128xbf16>
    %c0_16 = arith.constant 0 : index
    %c0_17 = arith.constant 0 : index
    %37 = vector.load %arg4[%c0_16, %c0_17] : memref<8x128xbf16, #tpu.memory_space<vmem>>, vector<8x128xbf16>
    tpu.vector_store %arg4[%c0_16, %c0_17], %36 {strides = array<i32>} : memref<8x128xbf16, #tpu.memory_space<vmem>>, vector<8x128xbf16>,
    return
  }
  func.func @transform_0(%arg0: i32) -> (i32, i32) {
    %c0_i32 = arith.constant 0 : i32
    %c0_i32_0 = arith.constant 0 : i32
    return %arg0, %c0_i32 : i32, i32
  }
  func.func @transform_1(%arg0: i32) -> (i32, i32) {
    %c0_i32 = arith.constant 0 : i32
    %c0_i32_0 = arith.constant 0 : i32
    %c0_i32_1 = arith.constant 0 : i32
    return %c0_i32, %c0_i32_0 : i32, i32
  }
  func.func @transform_2(%arg0: i32) -> (i32, i32) {
    %c0_i32 = arith.constant 0 : i32
    %c0_i32_0 = arith.constant 0 : i32
    %c0_i32_1 = arith.constant 0 : i32
    return %c0_i32, %c0_i32_0 : i32, i32
  }
  func.func @transform_3(%arg0: i32) -> (i32, i32) {
    %c0_i32 = arith.constant 0 : i32
    %c0_i32_0 = arith.constant 0 : i32
    return %arg0, %c0_i32 : i32, i32
  }
}

</mosaic_0001>

<bundles_post_ra>
// kernel: tpu_custom_call.1
= control target key start
LH: loop header
LB: loop body
LE: loop exit
PB: predicated region body
PF: predicated region fallthrough
CT: control target
= control target key end

     0   :  { %8 = vsyncpa [#allocation3], 0  ;;  %s520_s0 = inlined_call_operand.hbm [shape: bf16[8,16], index: 0, kind: input, shape index: {}]   ;;  %s521_s1 = inlined_call_operand.hbm [shape: bf16[272,128], index: 1, kind: input, shape index: {}]   ;;  %s522_s2 = inlined_call_operand.hbm [shape: f32[8,128], index: 2, kind: input, shape index: {}]   ;;  %s523_s3 = inlined_call_operand.hbm [shape: bf16[8,128], index: 3, kind: output, shape index: {}]  }
   0x1   :  { %9 = vsyncpa [#allocation6], 0  ;;  %s26_s14 = sshll.u32 %s521_s1, 4  ;;  %s27_s14 = int_to_ptr.hbm [resolvable:$true] %s26_s14 }
   0x2   :  { %10 = vsyncpa [#allocation4], 0  ;;  %s482_s15 = smov [#allocation5]   ;;  %s16_s19 = sshll.u32 %s520_s0, 4  ;;  %s17_s19 = int_to_ptr.hbm [resolvable:$true] %s16_s19 }
   0x3   :  { %s28_s16 = sshll.u32 %s482_s15, 4  ;;  %s483_s20 = smov 64   ;;  %s29_s16 = int_to_ptr.vmem [resolvable:$true] %s28_s16 }
   0x4   :  { %s484_s21 = smov 4   ;;  %s485_s22 = smov [#allocation2]  }
   0x5   :  { %34 = dma.hbm_to_vmem [thread:$0]  %s27_s14, 2176, %s29_s16, [#allocation6], %s483_s20, %s483_s20, %s484_s21  }
   0x6   :  { %s18_s23 = sshll.u32 %s485_s22, 4  ;;  %s40_s26 = sshll.u32 %s522_s2, 4  ;;  %s19_s23 = int_to_ptr.vmem [resolvable:$true] %s18_s23  ;;  %s41_s26 = int_to_ptr.hbm [resolvable:$true] %s40_s26 }
   0x7   :  { %21 = dma.hbm_to_vmem [thread:$0]  %s17_s19, 64, %s19_s23, [#allocation3]  }
   0x8   :  { %s486_s1 = smov [#allocation7]  }
   0x9   :  { %s42_s27 = sshll.u32 %s486_s1, 4  ;;  %s43_s27 = int_to_ptr.vmem [resolvable:$true] %s42_s27 }
   0xa   :  { %45 = dma.hbm_to_vmem [thread:$0]  %s41_s26, 128, %s43_s27, [#allocation6]  }
   0xb   :  { %476 = dma.done.wait [#allocation3], 64  }
   0xc   :  { %477 = vsyncadd [#allocation3], 4294967232 }
   0xd   :  { %478 = dma.done.wait [#allocation6], 2304  }
   0xe   :  { %479 = vsyncadd [#allocation6], 4294964992  ;;  %v350_v0 = vld [vmem:[#allocation5] sm:$0xff]  ;;  %v59_v2 = vld [vmem:[#allocation2] sm:$0xf]  ;;  %vm102_vm0 = vcmask 130048  }
   0xf   :  { %v358_v1 = vld [vmem:[#allocation5 + $0x40] sm:$0xff]  ;;  %113 = vmatpush.bf16.msra.mxu0 %v350_v0  ;;  %v357_v3 = vld [vmem:[#allocation5 + $0x38] sm:$0xff]  ;;  %v356_v4 = vld [vmem:[#allocation5 + $0x30] sm:$0xff]  ;;  %s487_s0 = smov [#allocation8]   ;;  %s270_s30 = sshll.u32 %s523_s3, 4  ;;  %s271_s30 = int_to_ptr.hbm [resolvable:$true] %s270_s30 }
  0x10   :  { %171 = vmatpush.bf16.msra.mxu1 %v358_v1  ;;  %v355_v5 = vld [vmem:[#allocation5 + $0x28] sm:$0xff]  ;;  %v354_v6 = vld [vmem:[#allocation5 + $0x20] sm:$0xff]  ;;  %v353_v7 = vld [vmem:[#allocation5 + $0x18] sm:$0xff]  ;;  %s268_s2 = sshll.u32 %s487_s0, 4  ;;  %s269_s2 = int_to_ptr.vmem [resolvable:$true] %s268_s2 }
  0x11   :  { %v352_v8 = vld [vmem:[#allocation5 + $0x10] sm:$0xff]  ;;  %v351_v9 = vld [vmem:[#allocation5 + $0x8] sm:$0xff]  ;;  %v366_v10 = vld [vmem:[#allocation5 + $0x80] sm:$0xff] }
  0x12   :  { %285 = vmatmul.msk.bf16.vlgmr.msra.gmra.mxu0 %vm102_vm0, %v59_v2  ;;  %236 = vmatpush.bf16.msra.mxu2 %v366_v10  ;;  %v365_v11 = vld [vmem:[#allocation5 + $0x78] sm:$0xff]  ;;  %v364_v12 = vld [vmem:[#allocation5 + $0x70] sm:$0xff]  ;;  %v363_v13 = vld [vmem:[#allocation5 + $0x68] sm:$0xff] }
  0x13   :  { %v362_v14 = vld [vmem:[#allocation5 + $0x60] sm:$0xff]  ;;  %v361_v15 = vld [vmem:[#allocation5 + $0x58] sm:$0xff]  ;;  %v373_v16 = vld [vmem:[#allocation7] ss:$0 sm:$0xff] }
  0x14   :  { %172 = vmatpush.bf16.msra.mxu1 %v357_v3  ;;  %v360_v22 = vld [vmem:[#allocation5 + $0x50] sm:$0xff]  ;;  %v359_v23 = vld [vmem:[#allocation5 + $0x48] sm:$0xff] }
  0x15   :  { %v374_v24 = vld [vmem:[#allocation7 + $0x1] ss:$0 sm:$0xff]  ;;  %v375_v30 = vld [vmem:[#allocation7 + $0x2] ss:$0 sm:$0xff] }
  0x16   :  { %237 = vmatpush.bf16.msra.mxu2 %v365_v11 }
  0x18   :  { %173 = vmatpush.bf16.msra.mxu1 %v356_v4 }
  0x1a   :  { %238 = vmatpush.bf16.msra.mxu2 %v364_v12 }
  0x1c   :  { %174 = vmatpush.bf16.msra.mxu1 %v355_v5 }
  0x1e   :  { %239 = vmatpush.bf16.msra.mxu2 %v363_v13 }
  0x20   :  { %175 = vmatpush.bf16.msra.mxu1 %v354_v6 }
  0x22   :  { %240 = vmatpush.bf16.msra.mxu2 %v362_v14 }
  0x24   :  { %176 = vmatpush.bf16.msra.mxu1 %v353_v7 }
  0x26   :  { %241 = vmatpush.bf16.msra.mxu2 %v361_v15 }
  0x28   :  { %177 = vmatpush.bf16.msra.mxu1 %v352_v8 }
  0x2a   :  { %242 = vmatpush.bf16.msra.mxu2 %v360_v22 }
  0x2c   :  { %178 = vmatpush.bf16.msra.mxu1 %v351_v9 }
  0x2e   :  { %243 = vmatpush.bf16.msra.mxu2 %v359_v23 }
  0x8f   :  { %v115_v17 = vpop.f32.mrf.mxu0 }
  0x90   :  { %v116_v18 = vadd.f32 %v373_v16, %v115_v17 }
  0x92   :  { %v119_v19 = vmax.f32 %v116_v18, 0.0 }
  0x94   :  { %v120_v20 = vpack.c.bf16 %v119_v19, %v119_v19 }
  0x96   :  { %179 = vmatmul.bf16.vlgmr.msra.gmra.mxu1 %v120_v20 }
  0x97   :  { %v117_v21 = vpop.f32.mrf.mxu0 }
 0x113   :  { %v180_v25 = vpop.f32.mrf.mxu1 }
 0x114   :  { %v181_v26 = vadd.f32 %v374_v24, %v180_v25 }
 0x116   :  { %v184_v27 = vmax.f32 %v181_v26, 0.0 }
 0x118   :  { %v185_v28 = vpack.c.bf16 %v184_v27, %v184_v27 }
 0x11a   :  { %244 = vmatmul.bf16.vlgmr.msra.gmra.mxu2 %v185_v28 }
 0x11b   :  { %v182_v29 = vpop.f32.mrf.mxu1 }
 0x19d   :  { %v245_v31 = vpop.f32.mrf.mxu2 }
 0x19e   :  { %v246_v32 = vadd.f32 %v375_v30, %v245_v31 }
 0x1a0   :  { %249 = vmax.xlane.f32.xlu0 %v246_v32 }
 0x1a5   :  { %v247_v33 = vpop.f32.mrf.mxu2 }
 0x213   :  { %v250_v34 = vpop.xlane.xlu0 %249 }
 0x214   :  { %v251_v35 = vsub.f32 %v246_v32, %v250_v34 }
 0x216   :  { %v252_v36 = vmul.f32 1.442695, %v251_v35 }
 0x218   :  { %376 = vpow2.f32 %v252_v36 }
 0x21e   :  { %v377_v37 = vpop.eup %376 }
 0x21f   :  { %254 = vadd.xlane.f32.xlu0 %v377_v37 }
 0x292   :  { %v255_v38 = vpop.xlane.xlu0 %254 }
 0x293   :  { %378 = vrcp.f32 %v255_v38 }
 0x299   :  { %v379_v39 = vpop.eup %378 }
 0x29a   :  { %v257_v40 = vmul.f32 %v379_v39, %v255_v38 }
 0x29c   :  { %v258_v41 = vsub.f32 2.0, %v257_v40 }
 0x29e   :  { %v259_v42 = vmul.f32 %v379_v39, %v258_v41 }
 0x2a0   :  { %v260_v43 = vmul.f32 %v377_v37, %v259_v42 }
 0x2a2   :  { %v261_v44 = vpack.c.bf16 %v260_v43, %v260_v43 }
 0x2a4   :  { %262 = vst [vmem:[#allocation8] sm:$0xf] %v261_v44 }
 0x2a5   :  { %273 = dma.vmem_to_hbm [thread:$0]  %s269_s2, 64, %s271_s30, [#allocation4]  }
 0x2a6   :  { %480 = dma.done.wait [#allocation4], 64  }
 0x2a7   :  { %481 = vsyncadd [#allocation4], 4294967232 }
 0x2a8   :  { %278 = vsyncpa [#allocation3], 1 }
 0x2a9   :  { %279 = vsyncpa [#allocation6], 1 }
 0x2aa   :  { %280 = vsyncpa [#allocation4], 1 }

</bundles_post_ra>
